<compile_context>
chip_gen: v7x
topology: tpu7x:2x2x1
jax: 0.10.0
libtpu: 0.0.40
codegen_flags: <defaults>
</compile_context>

<pallas_src>
import functools
import math

import jax
import jax.numpy as jnp
from jax.experimental import pallas as pl
from jax.experimental.pallas import tpu as pltpu


def _plain_kernel(x_ref, g_ref, b_ref, o_ref, *, eps, inv_nm1):
    """One LayerNorm segment per kernel row (lane width == dim). Two-pass, f32 acc."""
    x = x_ref[...].astype(jnp.float32)
    mean = jnp.mean(x, axis=-1, keepdims=True)
    centered = x - mean
    var = jnp.sum(centered * centered, axis=-1, keepdims=True) * inv_nm1
    inv_std = jax.lax.rsqrt(var + eps)
    o_ref[...] = (g_ref[...] * centered * inv_std + b_ref[...]).astype(o_ref.dtype)


def _packed_kernel(x_ref, g_ref, b_ref, s_ref, o_ref, *, eps, inv_n, inv_nm1):
    """k independent length-`dim` segments packed along the lane axis of each row.

    Per-segment sums are computed on the otherwise-idle MXU with a (W, W)
    block-diagonal 0/1 matrix: (R, W) @ (W, W) lands every segment's sum,
    broadcast across its own lanes, in place — no masked selects and no O(k)
    cross-lane reductions on the VPU/XLU.  HIGHEST precision keeps f32-level
    accuracy (the 0/1 matrix is exact; x must not be truncated to bf16);
    Precision.HIGH (bf16x3) is enough if MXU time ever matters on v7x.
    """
    x = x_ref[...].astype(jnp.float32)
    seg = s_ref[...]
    sums = jnp.dot(x, seg, preferred_element_type=jnp.float32,
                   precision=jax.lax.Precision.HIGHEST)
    mean = sums * inv_n
    centered = x - mean
    sq = centered * centered
    ssq = jnp.dot(sq, seg, preferred_element_type=jnp.float32,
                  precision=jax.lax.Precision.HIGHEST)
    inv_std = jax.lax.rsqrt(ssq * inv_nm1 + eps)
    o_ref[...] = (g_ref[...] * centered * inv_std + b_ref[...]).astype(o_ref.dtype)


def _vmem_info():
    phys = 64 << 20  # conservative default (v7x per-TensorCore VMEM)
    try:
        phys = int(pltpu.get_tpu_info().vmem_capacity_bytes)
    except Exception:
        pass
    budget = (phys * 3) // 4  # headroom for compiler-internal scratch
    return phys, budget


def layernorm(x, g, b, eps=1e-5, target_block_bytes=8 << 20):
    orig_shape = x.shape
    dim = orig_shape[-1]
    rows = math.prod(orig_shape[:-1]) if len(orig_shape) > 1 else 1
    itemsize = jnp.dtype(x.dtype).itemsize

    # ---- lane-dense packing: fold k length-dim segments into each kernel row ----
    # k = lcm(dim, 128)/dim makes the packed lane width a multiple of 128, so every
    # load/store is an unmasked full-lane op.  Rows are zero-padded to a multiple
    # of k (pure layout plumbing; padded rows are sliced off afterwards).
    k = 1
    if 1 < dim < 128:
        k_cand = math.lcm(dim, 128) // dim
        if k_cand * dim <= 512:  # keep the block-diag segment matrix small
            k = k_cand
    lane_w = k * dim

    x_flat = x.reshape(rows, dim)
    pad = (-rows) % k
    if pad:
        x_flat = jnp.pad(x_flat, ((0, pad), (0, 0)))
    n_rows = (rows + pad) // k
    x2 = x_flat.reshape(n_rows, lane_w)

    g2 = jnp.tile(jnp.asarray(g, jnp.float32).reshape(-1), k).reshape(1, lane_w)
    b2 = jnp.tile(jnp.asarray(b, jnp.float32).reshape(-1), k).reshape(1, lane_w)

    # ---- block sizing: biggest row tile that fits the target bytes + VMEM budget ----
    phys_vmem, vmem_budget = _vmem_info()
    align = 32 if itemsize == 1 else (16 if itemsize == 2 else 8)  # sublane packing
    row_in_bytes = lane_w * itemsize
    # per-row VMEM: double-buffered in+out blocks + ~6 f32-sized live temporaries
    per_row_vmem = lane_w * (4 * itemsize + 6 * 4)
    fixed_vmem = (2 << 20) + (2 * lane_w * lane_w * 4 if k > 1 else 0)

    block_rows = max(target_block_bytes // row_in_bytes, 1)
    block_rows = min(block_rows, max((vmem_budget - fixed_vmem) // per_row_vmem, 1))
    block_rows = max((block_rows // align) * align, align)

    # keep >=2 (target ~8) grid steps: DMA/compute overlap + v7x 2-TC sharding
    n_align_blocks = n_rows // align
    if n_align_blocks >= 2:
        target_blocks = min(8, n_align_blocks)
        cap = ((pl.cdiv(n_rows, target_blocks) + align - 1) // align) * align
        block_rows = max((min(block_rows, cap) // align) * align, align)
    if block_rows >= n_rows:
        block_rows = n_rows  # tiny input: single full-extent block is legal
    grid = (pl.cdiv(n_rows, block_rows),)  # partial last block masked by Pallas

    # ---- honest VMEM declaration: never clamp below the computed requirement ----
    req = block_rows * per_row_vmem + fixed_vmem
    vmem_limit = max(req, 16 << 20)
    vmem_limit = min(vmem_limit, max(vmem_budget, req))
    vmem_limit = int(min(vmem_limit, phys_vmem))
    # TODO(synk): for single rows larger than the VMEM budget (dim ~ 10^5+ f32),
    # split the lane axis into a second grid dimension (stats pass + normalize
    # pass); current code declares an honest limit but cannot tile such rows.

    inv_nm1 = (1.0 / (dim - 1)) if dim > 1 else float("nan")  # torch unbiased var

    common_specs = [
        pl.BlockSpec((block_rows, lane_w), lambda i: (i, 0)),
        pl.BlockSpec((1, lane_w), lambda i: (0, 0)),
        pl.BlockSpec((1, lane_w), lambda i: (0, 0)),
    ]
    if k == 1:
        kernel = functools.partial(_plain_kernel, eps=float(eps), inv_nm1=inv_nm1)
        in_specs = common_specs
        args = (x2, g2, b2)
    else:
        lane_id = jnp.arange(lane_w) // dim
        seg_mat = (lane_id[:, None] == lane_id[None, :]).astype(jnp.float32)
        kernel = functools.partial(_packed_kernel, eps=float(eps),
                                   inv_n=1.0 / dim, inv_nm1=inv_nm1)
        in_specs = common_specs + [pl.BlockSpec((lane_w, lane_w), lambda i: (0, 0))]
        args = (x2, g2, b2, seg_mat)

    out = pl.pallas_call(
        kernel,
        out_shape=jax.ShapeDtypeStruct((n_rows, lane_w), x.dtype),
        grid_spec=pltpu.PrefetchScalarGridSpec(
            num_scalar_prefetch=0,
            grid=grid,
            in_specs=in_specs,
            out_specs=pl.BlockSpec((block_rows, lane_w), lambda i: (i, 0)),
        ),
        compiler_params=pltpu.CompilerParams(
            dimension_semantics=("parallel",),
            vmem_limit_bytes=vmem_limit,
        ),
    )(*args)

    out = out.reshape(n_rows * k, dim)
    if pad:
        out = out[:rows]
    return out.reshape(orig_shape)


def layernorm_ref(x, g, b, eps=1e-5):
    xf = x.astype(jnp.float32)
    mean = jnp.mean(xf, axis=-1, keepdims=True)
    var = jnp.var(xf, axis=-1, keepdims=True, ddof=1)  # unbiased, matches torch.var
    return (g * (xf - mean) / jnp.sqrt(var + eps) + b).astype(x.dtype)


if __name__ == "__main__":
    key = jax.random.PRNGKey(0)
    batch, seq, hidden = 2, 8, 32
    x = jax.random.normal(key, (batch, seq, hidden), dtype=jnp.float32)

    # deterministic parameter init, matching nn.Parameter(ones(dim)) / zeros(dim)
    g = jnp.ones((hidden,), dtype=jnp.float32)
    b = jnp.zeros((hidden,), dtype=jnp.float32)

    y = jax.block_until_ready(layernorm(x, g, b, eps=1e-5))

    y_ref = layernorm_ref(x, g, b, eps=1e-5)
    assert y.shape == x.shape
    assert jnp.allclose(y, y_ref, atol=1e-5, rtol=1e-5), "mismatch vs reference"

    print("KERNEL_OK")
</pallas_src>

<mosaic_0001>
module attributes {stable_mosaic.version = 11 : i64} {
  func.func @_packed_kernel(%arg0: i32, %arg1: memref<4x128xf32, #tpu.memory_space<vmem>>, %arg2: memref<1x128xf32, #tpu.memory_space<vmem>>, %arg3: memref<1x128xf32, #tpu.memory_space<vmem>>, %arg4: memref<128x128xf32, #tpu.memory_space<vmem>>, %arg5: memref<4x128xf32, #tpu.memory_space<vmem>>) attributes {dimension_semantics = [#tpu.dimension_semantics<parallel>], iteration_bounds = array<i64: 1>, scalar_prefetch = 0 : i64, scratch_operands = 0 : i64, tpu.core_type = #tpu.core_type<tc>, window_params = [{transform_indices = @transform_0, window_bounds = array<i64: 4, 128>}, {pipeline_mode = #tpu.pipeline_mode<synchronous>, transform_indices = @transform_1, window_bounds = array<i64: 1, 128>}, {pipeline_mode = #tpu.pipeline_mode<synchronous>, transform_indices = @transform_2, window_bounds = array<i64: 1, 128>}, {pipeline_mode = #tpu.pipeline_mode<synchronous>, transform_indices = @transform_3, window_bounds = array<i64: 128, 128>}, {transform_indices = @transform_4, window_bounds = array<i64: 4, 128>}]} {
    %c0 = arith.constant 0 : index
    %c0_0 = arith.constant 0 : index
    %0 = vector.load %arg1[%c0, %c0_0] : memref<4x128xf32, #tpu.memory_space<vmem>>, vector<4x128xf32>
    %c0_1 = arith.constant 0 : index
    %c0_2 = arith.constant 0 : index
    %1 = vector.load %arg4[%c0_1, %c0_2] : memref<128x128xf32, #tpu.memory_space<vmem>>, vector<128x128xf32>
    %cst = arith.constant dense<0.000000e+00> : vector<4x128xf32>
    %2 = tpu.matmul %0, %1, %cst {dimension_numbers = #tpu.dot_dimension_numbers<[1], [0], [0], [1], [0, 0, 1, 1], [], []>, precision = #tpu.contract_precision<fp32>} : vector<4x128xf32>, vector<128x128xf32>, vector<4x128xf32> -> vector<4x128xf32>
    %cst_3 = arith.constant 3.125000e-02 : f32
    %3 = vector.broadcast %cst_3 : f32 to vector<4x128xf32>
    %4 = arith.mulf %2, %3 : vector<4x128xf32>
    %5 = arith.subf %0, %4 : vector<4x128xf32>
    %6 = arith.mulf %5, %5 : vector<4x128xf32>
    %cst_4 = arith.constant dense<0.000000e+00> : vector<4x128xf32>
    %7 = tpu.matmul %6, %1, %cst_4 {dimension_numbers = #tpu.dot_dimension_numbers<[1], [0], [0], [1], [0, 0, 1, 1], [], []>, precision = #tpu.contract_precision<fp32>} : vector<4x128xf32>, vector<128x128xf32>, vector<4x128xf32> -> vector<4x128xf32>
    %cst_5 = arith.constant 0.0322580636 : f32
    %8 = vector.broadcast %cst_5 : f32 to vector<4x128xf32>
    %9 = arith.mulf %7, %8 : vector<4x128xf32>
    %cst_6 = arith.constant 9.99999974E-6 : f32
    %10 = vector.broadcast %cst_6 : f32 to vector<4x128xf32>
    %11 = arith.addf %9, %10 : vector<4x128xf32>
    %12 = math.rsqrt %11 : vector<4x128xf32>
    %c0_7 = arith.constant 0 : index
    %c0_8 = arith.constant 0 : index
    %13 = vector.load %arg2[%c0_7, %c0_8] : memref<1x128xf32, #tpu.memory_space<vmem>>, vector<1x128xf32>
    %14 = vector.broadcast %13 : vector<1x128xf32> to vector<4x128xf32>
    %15 = arith.mulf %14, %5 : vector<4x128xf32>
    %16 = arith.mulf %15, %12 : vector<4x128xf32>
    %c0_9 = arith.constant 0 : index
    %c0_10 = arith.constant 0 : index
    %17 = vector.load %arg3[%c0_9, %c0_10] : memref<1x128xf32, #tpu.memory_space<vmem>>, vector<1x128xf32>
    %18 = vector.broadcast %17 : vector<1x128xf32> to vector<4x128xf32>
    %19 = arith.addf %16, %18 : vector<4x128xf32>
    %c0_11 = arith.constant 0 : index
    %c0_12 = arith.constant 0 : index
    %20 = vector.load %arg5[%c0_11, %c0_12] : memref<4x128xf32, #tpu.memory_space<vmem>>, vector<4x128xf32>
    tpu.vector_store %arg5[%c0_11, %c0_12], %19 {strides = array<i32>} : memref<4x128xf32, #tpu.memory_space<vmem>>, vector<4x128xf32>,
    return
  }
  func.func @transform_0(%arg0: i32) -> (i32, i32) {
    %c0_i32 = arith.constant 0 : i32
    %c0_i32_0 = arith.constant 0 : i32
    return %arg0, %c0_i32 : i32, i32
  }
  func.func @transform_1(%arg0: i32) -> (i32, i32) {
    %c0_i32 = arith.constant 0 : i32
    %c0_i32_0 = arith.constant 0 : i32
    %c0_i32_1 = arith.constant 0 : i32
    return %c0_i32, %c0_i32_0 : i32, i32
  }
  func.func @transform_2(%arg0: i32) -> (i32, i32) {
    %c0_i32 = arith.constant 0 : i32
    %c0_i32_0 = arith.constant 0 : i32
    %c0_i32_1 = arith.constant 0 : i32
    return %c0_i32, %c0_i32_0 : i32, i32
  }
  func.func @transform_3(%arg0: i32) -> (i32, i32) {
    %c0_i32 = arith.constant 0 : i32
    %c0_i32_0 = arith.constant 0 : i32
    %c0_i32_1 = arith.constant 0 : i32
    return %c0_i32, %c0_i32_0 : i32, i32
  }
  func.func @transform_4(%arg0: i32) -> (i32, i32) {
    %c0_i32 = arith.constant 0 : i32
    %c0_i32_0 = arith.constant 0 : i32
    return %arg0, %c0_i32 : i32, i32
  }
}

</mosaic_0001>

<bundles_post_ra>
// kernel: tpu_custom_call.1
= control target key start
LH: loop header
LB: loop body
LE: loop exit
PB: predicated region body
PF: predicated region fallthrough
CT: control target
= control target key end

     0   :  { %9 = vsyncpa [#allocation3], 0  ;;  %s2872_s0 = inlined_call_operand.hbm [shape: f32[4,128], index: 0, kind: input, shape index: {}]   ;;  %s2873_s1 = inlined_call_operand.vmem [shape: f32[1,128], index: 1, kind: input, shape index: {}]   ;;  %s2874_s2 = inlined_call_operand.vmem [shape: f32[1,128], index: 2, kind: input, shape index: {}]   ;;  %s2875_s3 = inlined_call_operand.hbm [shape: f32[128,128], index: 3, kind: input, shape index: {}]   ;;  %s2876_s4 = inlined_call_operand.hbm [shape: f32[4,128], index: 4, kind: output, shape index: {}]  }
   0x1   :  { %10 = vsyncpa [#allocation6], 0 }
   0x2   :  { %11 = vsyncpa [#allocation4], 0  ;;  %s2399_s15 = smov [#allocation2]   ;;  %s2400_s17 = smov [#allocation5]  }
   0x3   :  { %s18_s16 = sshll.u32 %s2399_s15, 4  ;;  %s31_s18 = sshll.u32 %s2400_s17, 4  ;;  %s19_s16 = int_to_ptr.vmem [resolvable:$true] %s18_s16  ;;  %s2432_s18 = int_to_ptr.vmem [resolvable:$true] %s31_s18 }
   0x4   :  { %s2327_s21 = scalar_lea.hbm %s2872_s0, 64 }
   0x5   :  { %p2328_p0 = scmp.ne.s32.totalorder %s2872_s0, %s2327_s21  ;;  %p2331_p1 = scmp.lt.u32.totalorder %s2327_s21, %s2872_s0 }
   0x7   :  { %p2333_p2 = pnand %p2331_p1, %p2328_p0 }
   0x9   :  { %2336 = shalt.err (!%p2333_p2)
}
   0xa   :  { %s2337_s26 = scalar_lea.vmem %s19_s16, 64  ;;  %p2342_p4 = scmp.lt.s32.totalorder %s19_s16, %s19_s16 }
   0xb   :  { %p2338_p3 = scmp.ne.s32.totalorder %s19_s16, %s2337_s26  ;;  %p2343_p5 = scmp.lt.s32.totalorder %s2337_s26, %s2337_s26 }
   0xd   :  { %p2344_p6 = por %p2343_p5, %p2342_p4 }
   0xf   :  { %p2345_p7 = pnand %p2344_p6, %p2338_p3 }
  0x11   :  { %2348 = shalt.err (!%p2345_p7)
}
  0x12   :  { %21 = dma.hbm_to_vmem [thread:$0]  %s2872_s0, 64, %s19_s16, [#allocation3]  }
  0x13   :  { %s2349_s5 = scalar_lea.hbm %s2875_s3, 2048 }
  0x14   :  { %p2350_p8 = scmp.ne.s32.totalorder %s2875_s3, %s2349_s5  ;;  %p2353_p9 = scmp.lt.u32.totalorder %s2349_s5, %s2875_s3 }
  0x16   :  { %p2355_p10 = pnand %p2353_p9, %p2350_p8 }
  0x18   :  { %2358 = shalt.err (!%p2355_p10)
}
  0x19   :  { %s2359_s10 = scalar_lea.vmem %s2432_s18, 2048  ;;  %p2364_p12 = scmp.lt.s32.totalorder %s2432_s18, %s2432_s18 }
  0x1a   :  { %p2360_p11 = scmp.ne.s32.totalorder %s2432_s18, %s2359_s10  ;;  %p2365_p13 = scmp.lt.s32.totalorder %s2359_s10, %s2359_s10 }
  0x1c   :  { %p2366_p0 = por %p2365_p13, %p2364_p12 }
  0x1e   :  { %p2367_p1 = pnand %p2366_p0, %p2360_p11 }
  0x20   :  { %2370 = shalt.err (!%p2367_p1)
}
  0x21   :  { %s2401_s0 = smov 128   ;;  %s2402_s11 = smov 8  }
  0x22   :  { %37 = dma.hbm_to_vmem [thread:$0]  %s2875_s3, 2048, %s2432_s18, [#allocation6], %s2401_s0, %s2401_s0, %s2402_s11  }
  0x23   :  { %2393 = dma.done.wait [#allocation3], 64  }
  0x24   :  { %2394 = vsyncadd [#allocation3], 4294967232 }
  0x25   :  { %2395 = dma.done.wait [#allocation6], 2048  }
  0x26   :  { %2396 = vsyncadd [#allocation6], 4294965248  ;;  %v2403_v0 = vmov 0.0|0.0   ;;  %vm2404_vm0 = vmmov 0   ;;  %v2405_v1 = vmov 0.0   ;;  %v45_v2 = vld [vmem:[#allocation5] sm:$0xff] }
  0x27   :  { %2009 = vmatprep.subr.bf16.mxu0 %v2403_v0  ;;  %1621 = vmatprep.mubr.msk.f32.mxu0 %vm2404_vm0, %v2405_v1  ;;  %v46_v3 = vld [vmem:[#allocation5 + $0x8] sm:$0xff]  ;;  %v47_v4 = vld [vmem:[#allocation5 + $0x10] sm:$0xff]  ;;  %v62_v5 = vand.u32 4294901760, %v45_v2  ;;  %v48_v7 = vld [vmem:[#allocation5 + $0x18] sm:$0xff]  ;;  %s2406_s17 = smov [#allocation7]  }
  0x28   :  { %2153 = vmatprep.subr.bf16.mxu1 %v2403_v0  ;;  %1831 = vmatprep.mubr.msk.f32.mxu1 %vm2404_vm0, %v2405_v1  ;;  %v65_v6 = vand.u32 4294901760, %v46_v3  ;;  %v68_v8 = vand.u32 4294901760, %v47_v4  ;;  %v71_v9 = vand.u32 4294901760, %v48_v7  ;;  %v49_v10 = vld [vmem:[#allocation5 + $0x20] sm:$0xff]  ;;  %v50_v11 = vld [vmem:[#allocation5 + $0x28] sm:$0xff]  ;;  %v51_v16 = vld [vmem:[#allocation5 + $0x30] sm:$0xff] }
  0x29   :  { %v74_v14 = vand.u32 4294901760, %v49_v10  ;;  %v77_v15 = vand.u32 4294901760, %v50_v11  ;;  %v52_v17 = vld [vmem:[#allocation5 + $0x38] sm:$0xff]  ;;  %v80_v19 = vand.u32 4294901760, %v51_v16  ;;  %v53_v21 = vld [vmem:[#allocation5 + $0x40] sm:$0xff]  ;;  %v54_v23 = vld [vmem:[#allocation5 + $0x48] sm:$0xff]  ;;  %v2491_v34 = vsub.f32 %v45_v2, %v62_v5 }
  0x2a   :  { %v2469_v12 = vpack.c.bf16 %v65_v6, %v62_v5  ;;  %v2472_v13 = vpack.c.bf16 %v71_v9, %v68_v8  ;;  %v83_v20 = vand.u32 4294901760, %v52_v17  ;;  %v2480_v22 = vld [vmem:[#allocation2] sm:$0xf]  ;;  %v55_v24 = vld [vmem:[#allocation5 + $0x50] sm:$0xff]  ;;  %v57_v26 = vld [vmem:[#allocation5 + $0x60] sm:$0xff]  ;;  %v86_v27 = vand.u32 4294901760, %v53_v21 }
  0x2b   :  { %v2478_v18 = vpack.c.bf16 %v77_v15, %v74_v14  ;;  %v56_v25 = vld [vmem:[#allocation5 + $0x58] sm:$0xff]  ;;  %v58_v28 = vld [vmem:[#allocation5 + $0x68] sm:$0xff]  ;;  %v59_v29 = vld [vmem:[#allocation5 + $0x70] sm:$0xff]  ;;  %v2486_v31 = vand.u32 4294901760, %v2480_v22  ;;  %v89_v33 = vand.u32 4294901760, %v54_v23  ;;  %v2493_v35 = vsub.f32 %v46_v3, %v65_v6  ;;  %s1373_s18 = sshll.u32 %s2406_s17, 4  ;;  %s1374_s18 = int_to_ptr.vmem [resolvable:$true] %s1373_s18 }
  0x2c   :  { %2011 = vmatpush3.bf16.msra.mxu0 %v2469_v12  ;;  %2155 = vmatpush3.bf16.msra.mxu1 %v2469_v12  ;;  %v60_v30 = vld [vmem:[#allocation5 + $0x78] sm:$0xff]  ;;  %v2489_v32 = vpack.c.bf16 %v83_v20, %v80_v19  ;;  %v92_v36 = vand.u32 4294901760, %v55_v24  ;;  %v95_v37 = vand.u32 4294901760, %v56_v25  ;;  %v98_v38 = vand.u32 4294901760, %v57_v26  ;;  %s2371_s19 = scalar_lea.vmem %s1374_s18, 64  ;;  %p2376_p3 = scmp.lt.s32.totalorder %s1374_s18, %s1374_s18 }
  0x2d   :  { %2012 = vmatprep.subr.bf16.mxu0 %v2403_v0  ;;  %2156 = vmatprep.subr.bf16.mxu1 %v2403_v0  ;;  %v101_v39 = vand.u32 4294901760, %v58_v28  ;;  %v104_v40 = vand.u32 4294901760, %v59_v29  ;;  %v107_v41 = vand.u32 4294901760, %v60_v30  ;;  %v2500_v42 = vsub.f32 %v2480_v22, %v2486_v31  ;;  %p2372_p2 = scmp.ne.s32.totalorder %s1374_s18, %s2371_s19  ;;  %p2377_p4 = scmp.lt.s32.totalorder %s2371_s19, %s2371_s19 }
  0x2e   :  { %v2502_v43 = vsub.f32 %v47_v4, %v68_v8  ;;  %v2505_v44 = vpack.c.bf16 %v89_v33, %v86_v27  ;;  %v155_v45 = vand.u32 4294901760, %v2491_v34  ;;  %v162_v46 = vand.u32 4294901760, %v2493_v35 }
  0x2f   :  { %v2509_v47 = vsub.f32 %v48_v7, %v71_v9  ;;  %v2513_v48 = vsub.f32 %v49_v10, %v74_v14  ;;  %v2516_v49 = vpack.c.bf16 %v95_v37, %v92_v36  ;;  %v2518_v50 = vpack.c.bf16 %v101_v39, %v98_v38  ;;  %p2378_p5 = por %p2377_p4, %p2376_p3 }
  0x30   :  { %2014 = vmatpush3.bf16.msra.mxu0 %v2472_v13  ;;  %2158 = vmatpush3.bf16.msra.mxu1 %v2472_v13  ;;  %v2520_v51 = vpack.c.bf16 %v107_v41, %v104_v40  ;;  %v144_v52 = vand.u32 4294901760, %v2500_v42  ;;  %v169_v53 = vand.u32 4294901760, %v2502_v43  ;;  %v2524_v54 = vsub.f32 %v50_v11, %v77_v15 }
  0x31   :  { %2015 = vmatprep.subr.bf16.mxu0 %v2403_v0  ;;  %2159 = vmatprep.subr.bf16.mxu1 %v2403_v0  ;;  %v2526_v55 = vsub.f32 %v51_v16, %v80_v19  ;;  %v156_v56 = vsub.f32 %v2491_v34, %v155_v45  ;;  %v163_v57 = vsub.f32 %v2493_v35, %v162_v46  ;;  %v176_v58 = vand.u32 4294901760, %v2509_v47  ;;  %p2379_p6 = pnand %p2378_p5, %p2372_p2 }
  0x32   :  { %v2532_v59 = vsub.f32 %v52_v17, %v83_v20  ;;  %v183_v60 = vand.u32 4294901760, %v2513_v48  ;;  %v2537_v61 = vsub.f32 %v53_v21, %v86_v27  ;;  %v2539_v62 = vsub.f32 %v54_v23, %v89_v33 }
  0x33   :  { %v2541_v63 = vsub.f32 %v55_v24, %v92_v36  ;;  %v2544_v2 = vsub.f32 %v56_v25, %v95_v37  ;;  %v2546_v3 = vsub.f32 %v57_v26, %v98_v38  ;;  %v2548_v4 = vsub.f32 %v58_v28, %v101_v39 }
  0x34   :  { %2017 = vmatpush3.bf16.msra.mxu0 %v2478_v18  ;;  %2161 = vmatpush3.bf16.msra.mxu1 %v2478_v18  ;;  %v2550_v5 = vsub.f32 %v59_v29, %v104_v40  ;;  %v145_v6 = vsub.f32 %v2500_v42, %v144_v52  ;;  %v170_v7 = vsub.f32 %v2502_v43, %v169_v53  ;;  %v190_v8 = vand.u32 4294901760, %v2524_v54 }
  0x35   :  { %2018 = vmatprep.subr.bf16.mxu0 %v2403_v0  ;;  %2162 = vmatprep.subr.bf16.mxu1 %v2403_v0  ;;  %v2557_v9 = vsub.f32 %v60_v30, %v107_v41  ;;  %v157_v10 = vand.u32 4294901760, %v156_v56  ;;  %v164_v11 = vand.u32 4294901760, %v163_v57  ;;  %v177_v14 = vsub.f32 %v2509_v47, %v176_v58 }
  0x36   :  { %v197_v15 = vand.u32 4294901760, %v2526_v55  ;;  %v204_v16 = vand.u32 4294901760, %v2532_v59  ;;  %v211_v17 = vand.u32 4294901760, %v2537_v61  ;;  %v218_v19 = vand.u32 4294901760, %v2539_v62 }
  0x37   :  { %v225_v20 = vand.u32 4294901760, %v2541_v63  ;;  %v232_v21 = vand.u32 4294901760, %v2544_v2  ;;  %v239_v23 = vand.u32 4294901760, %v2546_v3  ;;  %v246_v24 = vand.u32 4294901760, %v2548_v4 }
  0x38   :  { %2020 = vmatpush3.bf16.msra.mxu0 %v2489_v32  ;;  %2164 = vmatpush3.bf16.msra.mxu1 %v2489_v32  ;;  %v253_v25 = vand.u32 4294901760, %v2550_v5  ;;  %v260_v26 = vand.u32 4294901760, %v2557_v9  ;;  %v2574_v27 = vpack.c.bf16 %v162_v46, %v155_v45  ;;  %v2576_v28 = vpack.c.bf16 %v176_v58, %v169_v53 }
  0x39   :  { %2021 = vmatprep.subr.bf16.mxu0 %v2403_v0  ;;  %2165 = vmatprep.subr.bf16.mxu1 %v2403_v0  ;;  %v2578_v29 = vpack.c.bf16 %v190_v8, %v183_v60  ;;  %v2581_v30 = vpack.c.bf16 %v204_v16, %v197_v15  ;;  %v2583_v33 = vpack.c.bf16 %v218_v19, %v211_v17  ;;  %v146_v39 = vand.u32 4294901760, %v145_v6 }
  0x3a   :  { %v2585_v36 = vpack.c.bf16 %v232_v21, %v225_v20  ;;  %v2587_v37 = vpack.c.bf16 %v246_v24, %v239_v23  ;;  %v2590_v38 = vpack.c.bf16 %v260_v26, %v253_v25  ;;  %v184_v40 = vsub.f32 %v2513_v48, %v183_v60 }
  0x3b   :  { %v2596_v41 = vpack.c.bf16 %v164_v11, %v157_v10  ;;  %v171_v45 = vand.u32 4294901760, %v170_v7  ;;  %v178_v46 = vand.u32 4294901760, %v177_v14  ;;  %v191_v53 = vsub.f32 %v2524_v54, %v190_v8 }
  0x3c   :  { %2023 = vmatpush3.bf16.msra.mxu0 %v2505_v44  ;;  %2167 = vmatpush3.bf16.msra.mxu1 %v2505_v44  ;;  %v198_v56 = vsub.f32 %v2526_v55, %v197_v15  ;;  %v185_v58 = vand.u32 4294901760, %v184_v40  ;;  %v205_v6 = vsub.f32 %v2532_v59, %v204_v16  ;;  %v212_v11 = vsub.f32 %v2537_v61, %v211_v17 }
  0x3d   :  { %2024 = vmatprep.subr.bf16.mxu0 %v2403_v0  ;;  %2168 = vmatprep.subr.bf16.mxu1 %v2403_v0  ;;  %v2604_v57 = vpack.c.bf16 %v178_v46, %v171_v45  ;;  %v192_v60 = vand.u32 4294901760, %v191_v53  ;;  %v219_v14 = vsub.f32 %v2539_v62, %v218_v19  ;;  %v226_v15 = vsub.f32 %v2541_v63, %v225_v20 }
  0x3e   :  { %v199_v7 = vand.u32 4294901760, %v198_v56  ;;  %v206_v10 = vand.u32 4294901760, %v205_v6  ;;  %v233_v45 = vsub.f32 %v2544_v2, %v232_v21  ;;  %v240_v46 = vsub.f32 %v2546_v3, %v239_v23 }
  0x3f   :  { %v2611_v8 = vpack.c.bf16 %v192_v60, %v185_v58  ;;  %v220_v40 = vand.u32 4294901760, %v219_v14  ;;  %v227_v19 = vand.u32 4294901760, %v226_v15  ;;  %v247_v20 = vsub.f32 %v2548_v4, %v246_v24 }
  0x40   :  { %2026 = vmatpush3.bf16.msra.mxu0 %v2516_v49  ;;  %2170 = vmatpush3.bf16.msra.mxu1 %v2516_v49  ;;  %v2618_v16 = vpack.c.bf16 %v206_v10, %v199_v7  ;;  %v234_v53 = vand.u32 4294901760, %v233_v45  ;;  %v254_v56 = vsub.f32 %v2550_v5, %v253_v25  ;;  %v241_v21 = vand.u32 4294901760, %v240_v46 }
  0x41   :  { %2027 = vmatprep.subr.bf16.mxu0 %v2403_v0  ;;  %2171 = vmatprep.subr.bf16.mxu1 %v2403_v0  ;;  %v248_v60 = vand.u32 4294901760, %v247_v20  ;;  %v261_v23 = vsub.f32 %v2557_v9, %v260_v26  ;;  %v2645_v26 = vpack.c.bf16 %v2493_v35, %v2491_v34  ;;  %v2652_v10 = vpack.c.bf16 %v2509_v47, %v2502_v43 }
  0x42   :  { %v2630_v58 = vpack.c.bf16 %v234_v53, %v227_v19  ;;  %v255_v7 = vand.u32 4294901760, %v254_v56  ;;  %v2660_v34 = vpack.c.bf16 %v2524_v54, %v2513_v48  ;;  %v2666_v35 = vpack.c.bf16 %v2532_v59, %v2526_v55 }
  0x43   :  { %v2635_v6 = vpack.c.bf16 %v248_v60, %v241_v21  ;;  %v262_v24 = vand.u32 4294901760, %v261_v23  ;;  %v2672_v43 = vpack.c.bf16 %v2539_v62, %v2537_v61  ;;  %v2678_v47 = vpack.c.bf16 %v2544_v2, %v2541_v63 }
  0x44   :  { %2029 = vmatpush3.bf16.msra.mxu0 %v2518_v50  ;;  %2173 = vmatpush3.bf16.msra.mxu1 %v2518_v50  ;;  %v2684_v48 = vpack.c.bf16 %v2548_v4, %v2546_v3  ;;  %v2690_v54 = vpack.c.bf16 %v2557_v9, %v2550_v5 }
  0x45   :  { %2030 = vmatprep.subr.bf16.mxu0 %v2403_v0  ;;  %2174 = vmatprep.subr.bf16.mxu1 %v2403_v0  ;;  %v2639_v25 = vpack.c.bf16 %v262_v24, %v255_v7 }
  0x48   :  { %2032 = vmatpush3.bf16.msra.mxu0 %v2520_v51  ;;  %2176 = vmatpush3.bf16.msra.mxu1 %v2520_v51 }
  0x49   :  { %2033 = vmatprep.subr.bf16.mxu0 %v2403_v0  ;;  %2177 = vmatprep.subr.bf16.mxu1 %v2403_v0 }
  0x4b   :  { %1622 = vmatmul.mubr.f32.vlgmr.msra.gmra.mrb[0].mxu0 %v146_v39  ;;  %v213_v39 = vand.u32 4294901760, %v212_v11 }
  0x4c   :  { %2035 = vmatpush3.bf16.msra.mxu0 %v2596_v41  ;;  %1656 = vmatprep.mubr.msk.f32.mxu0 %vm2404_vm0, %v2405_v1 }
  0x4d   :  { %2036 = vmatprep.subr.bf16.mxu0 %v2403_v0  ;;  %v2624_v17 = vpack.c.bf16 %v220_v40, %v213_v39 }
  0x50   :  { %2038 = vmatpush3.bf16.msra.mxu0 %v2604_v57 }
  0x51   :  { %2039 = vmatprep.subr.bf16.mxu0 %v2403_v0 }
  0x54   :  { %2041 = vmatpush3.bf16.msra.mxu0 %v2611_v8 }
  0x55   :  { %2042 = vmatprep.subr.bf16.mxu0 %v2403_v0 }
  0x58   :  { %2044 = vmatpush3.bf16.msra.mxu0 %v2618_v16 }
  0x59   :  { %2045 = vmatprep.subr.bf16.mxu0 %v2403_v0 }
  0x5c   :  { %2047 = vmatpush3.bf16.msra.mxu0 %v2624_v17 }
  0x5d   :  { %2048 = vmatprep.subr.bf16.mxu0 %v2403_v0 }
  0x60   :  { %2050 = vmatpush3.bf16.msra.mxu0 %v2630_v58 }
  0x61   :  { %2051 = vmatprep.subr.bf16.mxu0 %v2403_v0 }
  0x64   :  { %2053 = vmatpush3.bf16.msra.mxu0 %v2635_v6 }
  0x65   :  { %2054 = vmatprep.subr.bf16.mxu0 %v2403_v0 }
  0x68   :  { %2056 = vmatpush3.bf16.msra.mxu0 %v2639_v25 }
  0x69   :  { %2057 = vmatprep.subr.bf16.mxu0 %v2403_v0 }
  0x6b   :  { %1657 = vmatmul.mubr.f32.vlgmr.msra.gmra.mrb[0].mxu0 %v2486_v31 }
  0x6c   :  { %2059 = vmatpush3.bf16.msra.mxu0 %v2645_v26  ;;  %1691 = vmatprep.mubr.msk.f32.mxu0 %vm2404_vm0, %v2405_v1 }
  0x6d   :  { %2060 = vmatprep.subr.bf16.mxu0 %v2403_v0 }
  0x70   :  { %2062 = vmatpush3.bf16.msra.mxu0 %v2652_v10 }
  0x71   :  { %2063 = vmatprep.subr.bf16.mxu0 %v2403_v0 }
  0x74   :  { %2065 = vmatpush3.bf16.msra.mxu0 %v2660_v34 }
  0x75   :  { %2066 = vmatprep.subr.bf16.mxu0 %v2403_v0 }
  0x78   :  { %2068 = vmatpush3.bf16.msra.mxu0 %v2666_v35 }
  0x79   :  { %2069 = vmatprep.subr.bf16.mxu0 %v2403_v0 }
  0x7c   :  { %2071 = vmatpush3.bf16.msra.mxu0 %v2672_v43 }
  0x7d   :  { %2072 = vmatprep.subr.bf16.mxu0 %v2403_v0 }
  0x80   :  { %2074 = vmatpush3.bf16.msra.mxu0 %v2678_v47 }
  0x81   :  { %2075 = vmatprep.subr.bf16.mxu0 %v2403_v0 }
  0x84   :  { %2077 = vmatpush3.bf16.msra.mxu0 %v2684_v48 }
  0x85   :  { %2078 = vmatprep.subr.bf16.mxu0 %v2403_v0 }
  0x88   :  { %2080 = vmatpush3.bf16.msra.mxu0 %v2690_v54 }
  0x89   :  { %2081 = vmatprep.subr.bf16.mxu0 %v2403_v0 }
  0x8b   :  { %1692 = vmatmul.mubr.f32.vlgmr.msra.gmra.mrb[0].mxu0 %v2500_v42 }
  0x8c   :  { %2083 = vmatpush3.bf16.msra.mxu0 %v2469_v12  ;;  %1726 = vmatprep.mubr.msk.f32.mxu0 %vm2404_vm0, %v2405_v1 }
  0x8d   :  { %2084 = vmatprep.subr.bf16.mxu0 %v2403_v0 }
  0x90   :  { %2086 = vmatpush3.bf16.msra.mxu0 %v2472_v13 }
  0x91   :  { %2087 = vmatprep.subr.bf16.mxu0 %v2403_v0 }
  0x94   :  { %2089 = vmatpush3.bf16.msra.mxu0 %v2478_v18 }
  0x95   :  { %2090 = vmatprep.subr.bf16.mxu0 %v2403_v0 }
  0x98   :  { %2092 = vmatpush3.bf16.msra.mxu0 %v2489_v32 }
  0x99   :  { %2093 = vmatprep.subr.bf16.mxu0 %v2403_v0 }
  0x9c   :  { %2095 = vmatpush3.bf16.msra.mxu0 %v2505_v44 }
  0x9d   :  { %2096 = vmatprep.subr.bf16.mxu0 %v2403_v0 }
  0xa0   :  { %2098 = vmatpush3.bf16.msra.mxu0 %v2516_v49 }
  0xa1   :  { %2099 = vmatprep.subr.bf16.mxu0 %v2403_v0 }
  0xa4   :  { %2101 = vmatpush3.bf16.msra.mxu0 %v2518_v50 }
  0xa5   :  { %2102 = vmatprep.subr.bf16.mxu0 %v2403_v0 }
  0xa8   :  { %2104 = vmatpush3.bf16.msra.mxu0 %v2520_v51 }
  0xa9   :  { %2105 = vmatprep.subr.bf16.mxu0 %v2403_v0 }
  0xab   :  { %1727 = vmatmul.mubr.f32.vlgmr.msra.gmra.mrb[0].mxu0 %v144_v52 }
  0xac   :  { %2107 = vmatpush3.bf16.msra.mxu0 %v2574_v27  ;;  %1761 = vmatprep.mubr.msk.f32.mxu0 %vm2404_vm0, %v2405_v1 }
  0xad   :  { %2108 = vmatprep.subr.bf16.mxu0 %v2403_v0 }
  0xb0   :  { %2110 = vmatpush3.bf16.msra.mxu0 %v2576_v28 }
  0xb1   :  { %2111 = vmatprep.subr.bf16.mxu0 %v2403_v0 }
  0xb4   :  { %2113 = vmatpush3.bf16.msra.mxu0 %v2578_v29 }
  0xb5   :  { %2114 = vmatprep.subr.bf16.mxu0 %v2403_v0 }
  0xb8   :  { %2116 = vmatpush3.bf16.msra.mxu0 %v2581_v30 }
  0xb9   :  { %2117 = vmatprep.subr.bf16.mxu0 %v2403_v0 }
  0xbc   :  { %2119 = vmatpush3.bf16.msra.mxu0 %v2583_v33 }
  0xbd   :  { %2120 = vmatprep.subr.bf16.mxu0 %v2403_v0 }
  0xc0   :  { %2122 = vmatpush3.bf16.msra.mxu0 %v2585_v36 }
  0xc1   :  { %2123 = vmatprep.subr.bf16.mxu0 %v2403_v0 }
  0xc4   :  { %2125 = vmatpush3.bf16.msra.mxu0 %v2587_v37 }
  0xc5   :  { %2126 = vmatprep.subr.bf16.mxu0 %v2403_v0 }
  0xc8   :  { %2128 = vmatpush3.bf16.msra.mxu0 %v2590_v38 }
  0xc9   :  { %2129 = vmatprep.subr.bf16.mxu0 %v2403_v0 }
  0xcb   :  { %1762 = vmatmul.mubr.f32.vlgmr.msra.gmra.mrb[0].mxu0 %v2486_v31 }
  0xcc   :  { %2131 = vmatpush3.bf16.msra.mxu0 %v2469_v12  ;;  %1796 = vmatprep.mubr.msk.f32.mxu0 %vm2404_vm0, %v2405_v1 }
  0xcd   :  { %2132 = vmatprep.subr.bf16.mxu0 %v2403_v0 }
  0xd0   :  { %2134 = vmatpush3.bf16.msra.mxu0 %v2472_v13 }
  0xd1   :  { %2135 = vmatprep.subr.bf16.mxu0 %v2403_v0 }
  0xd4   :  { %2137 = vmatpush3.bf16.msra.mxu0 %v2478_v18 }
  0xd5   :  { %2138 = vmatprep.subr.bf16.mxu0 %v2403_v0 }
  0xd8   :  { %2140 = vmatpush3.bf16.msra.mxu0 %v2489_v32 }
  0xd9   :  { %2141 = vmatprep.subr.bf16.mxu0 %v2403_v0 }
  0xdc   :  { %2143 = vmatpush3.bf16.msra.mxu0 %v2505_v44 }
  0xdd   :  { %2144 = vmatprep.subr.bf16.mxu0 %v2403_v0 }
  0xe0   :  { %2146 = vmatpush3.bf16.msra.mxu0 %v2516_v49 }
  0xe1   :  { %2147 = vmatprep.subr.bf16.mxu0 %v2403_v0 }
  0xe4   :  { %2149 = vmatpush3.bf16.msra.mxu0 %v2518_v50 }
  0xe5   :  { %2150 = vmatprep.subr.bf16.mxu0 %v2403_v0 }
  0xe8   :  { %2152 = vmatpush3.bf16.msra.mxu0 %v2520_v51 }
  0xeb   :  { %1797 = vmatmul.mubr.f32.vlgmr.msra.gmra.mrb[0].mxu0 %v2486_v31 }
 0x1be   :  { %v698_v42 = vpop.f32.mrb[0].mxu0 }
 0x1bf   :  { %v702_v52 = vmul.f32 0.03125, %v698_v42  ;;  %v1798_v55 = vpop.f32.mrb[1].mxu0 }
 0x1c1   :  { %v2754_v59 = vsub.f32 %v2480_v22, %v702_v52  ;;  %v1383_v22 = vld [vmem:[%s2873_s1] ss:$0 sm:$0xff] }
 0x1c3   :  { %v704_v61 = vmul.f32 %v2754_v59, %v2754_v59  ;;  %v1356_v31 = vmul.f32 %v1383_v22, %v2754_v59 }
 0x1c5   :  { %v2758_v62 = vand.u32 4294901760, %v704_v61 }
 0x1c7   :  { %v787_v63 = vsub.f32 %v704_v61, %v2758_v62 }
 0x1c9   :  { %v788_v2 = vand.u32 4294901760, %v787_v63 }
 0x1cb   :  { %v789_v3 = vsub.f32 %v787_v63, %v788_v2 }
 0x1cd   :  { %v790_v4 = vand.u32 4294901760, %v789_v3 }
 0x1cf   :  { %1832 = vmatmul.mubr.f32.vlgmr.msra.gmra.mrb[0].mxu1 %v790_v4 }
 0x1d0   :  { %2179 = vmatpush3.bf16.msra.mxu1 %v2596_v41  ;;  %1866 = vmatprep.mubr.msk.f32.mxu1 %vm2404_vm0, %v2405_v1 }
 0x1d1   :  { %2180 = vmatprep.subr.bf16.mxu1 %v2403_v0 }
 0x1d4   :  { %2182 = vmatpush3.bf16.msra.mxu1 %v2604_v57 }
 0x1d5   :  { %2183 = vmatprep.subr.bf16.mxu1 %v2403_v0 }
 0x1d8   :  { %2185 = vmatpush3.bf16.msra.mxu1 %v2611_v8 }
 0x1d9   :  { %2186 = vmatprep.subr.bf16.mxu1 %v2403_v0 }
 0x1dc   :  { %2188 = vmatpush3.bf16.msra.mxu1 %v2618_v16 }
 0x1dd   :  { %2189 = vmatprep.subr.bf16.mxu1 %v2403_v0 }
 0x1e0   :  { %2191 = vmatpush3.bf16.msra.mxu1 %v2624_v17 }
 0x1e1   :  { %2192 = vmatprep.subr.bf16.mxu1 %v2403_v0 }
 0x1e4   :  { %2194 = vmatpush3.bf16.msra.mxu1 %v2630_v58 }
 0x1e5   :  { %2195 = vmatprep.subr.bf16.mxu1 %v2403_v0 }
 0x1e8   :  { %2197 = vmatpush3.bf16.msra.mxu1 %v2635_v6 }
 0x1e9   :  { %2198 = vmatprep.subr.bf16.mxu1 %v2403_v0 }
 0x1ec   :  { %2200 = vmatpush3.bf16.msra.mxu1 %v2639_v25 }
 0x1ed   :  { %2201 = vmatprep.subr.bf16.mxu1 %v2403_v0 }
 0x1ef   :  { %1867 = vmatmul.mubr.f32.vlgmr.msra.gmra.mrb[0].mxu1 %v2758_v62 }
 0x1f0   :  { %2203 = vmatpush3.bf16.msra.mxu1 %v2645_v26  ;;  %1901 = vmatprep.mubr.msk.f32.mxu1 %vm2404_vm0, %v2405_v1 }
 0x1f1   :  { %2204 = vmatprep.subr.bf16.mxu1 %v2403_v0 }
 0x1f4   :  { %2206 = vmatpush3.bf16.msra.mxu1 %v2652_v10 }
 0x1f5   :  { %2207 = vmatprep.subr.bf16.mxu1 %v2403_v0 }
 0x1f8   :  { %2209 = vmatpush3.bf16.msra.mxu1 %v2660_v34 }
 0x1f9   :  { %2210 = vmatprep.subr.bf16.mxu1 %v2403_v0 }
 0x1fc   :  { %2212 = vmatpush3.bf16.msra.mxu1 %v2666_v35 }
 0x1fd   :  { %2213 = vmatprep.subr.bf16.mxu1 %v2403_v0 }
 0x200   :  { %2215 = vmatpush3.bf16.msra.mxu1 %v2672_v43 }
 0x201   :  { %2216 = vmatprep.subr.bf16.mxu1 %v2403_v0 }
 0x204   :  { %2218 = vmatpush3.bf16.msra.mxu1 %v2678_v47 }
 0x205   :  { %2219 = vmatprep.subr.bf16.mxu1 %v2403_v0 }
 0x208   :  { %2221 = vmatpush3.bf16.msra.mxu1 %v2684_v48 }
 0x209   :  { %2222 = vmatprep.subr.bf16.mxu1 %v2403_v0 }
 0x20c   :  { %2224 = vmatpush3.bf16.msra.mxu1 %v2690_v54 }
 0x20d   :  { %2225 = vmatprep.subr.bf16.mxu1 %v2403_v0 }
 0x20f   :  { %1902 = vmatmul.mubr.f32.vlgmr.msra.gmra.mrb[0].mxu1 %v787_v63 }
 0x210   :  { %2227 = vmatpush3.bf16.msra.mxu1 %v2469_v12  ;;  %1936 = vmatprep.mubr.msk.f32.mxu1 %vm2404_vm0, %v2405_v1 }
 0x211   :  { %2228 = vmatprep.subr.bf16.mxu1 %v2403_v0 }
 0x214   :  { %2230 = vmatpush3.bf16.msra.mxu1 %v2472_v13 }
 0x215   :  { %2231 = vmatprep.subr.bf16.mxu1 %v2403_v0 }
 0x218   :  { %2233 = vmatpush3.bf16.msra.mxu1 %v2478_v18 }
 0x219   :  { %2234 = vmatprep.subr.bf16.mxu1 %v2403_v0 }
 0x21c   :  { %2236 = vmatpush3.bf16.msra.mxu1 %v2489_v32 }
 0x21d   :  { %2237 = vmatprep.subr.bf16.mxu1 %v2403_v0 }
 0x220   :  { %2239 = vmatpush3.bf16.msra.mxu1 %v2505_v44 }
 0x221   :  { %2240 = vmatprep.subr.bf16.mxu1 %v2403_v0 }
 0x224   :  { %2242 = vmatpush3.bf16.msra.mxu1 %v2516_v49 }
 0x225   :  { %2243 = vmatprep.subr.bf16.mxu1 %v2403_v0 }
 0x228   :  { %2245 = vmatpush3.bf16.msra.mxu1 %v2518_v50 }
 0x229   :  { %2246 = vmatprep.subr.bf16.mxu1 %v2403_v0 }
 0x22c   :  { %2248 = vmatpush3.bf16.msra.mxu1 %v2520_v51 }
 0x22d   :  { %2249 = vmatprep.subr.bf16.mxu1 %v2403_v0 }
 0x22f   :  { %1937 = vmatmul.mubr.f32.vlgmr.msra.gmra.mrb[0].mxu1 %v788_v2 }
 0x230   :  { %2251 = vmatpush3.bf16.msra.mxu1 %v2574_v27  ;;  %1971 = vmatprep.mubr.msk.f32.mxu1 %vm2404_vm0, %v2405_v1 }
 0x231   :  { %2252 = vmatprep.subr.bf16.mxu1 %v2403_v0 }
 0x234   :  { %2254 = vmatpush3.bf16.msra.mxu1 %v2576_v28 }
 0x235   :  { %2255 = vmatprep.subr.bf16.mxu1 %v2403_v0 }
 0x238   :  { %2257 = vmatpush3.bf16.msra.mxu1 %v2578_v29 }
 0x239   :  { %2258 = vmatprep.subr.bf16.mxu1 %v2403_v0 }
 0x23c   :  { %2260 = vmatpush3.bf16.msra.mxu1 %v2581_v30 }
 0x23d   :  { %2261 = vmatprep.subr.bf16.mxu1 %v2403_v0 }
 0x240   :  { %2263 = vmatpush3.bf16.msra.mxu1 %v2583_v33 }
 0x241   :  { %2264 = vmatprep.subr.bf16.mxu1 %v2403_v0 }
 0x244   :  { %2266 = vmatpush3.bf16.msra.mxu1 %v2585_v36 }
 0x245   :  { %2267 = vmatprep.subr.bf16.mxu1 %v2403_v0 }
 0x248   :  { %2269 = vmatpush3.bf16.msra.mxu1 %v2587_v37 }
 0x249   :  { %2270 = vmatprep.subr.bf16.mxu1 %v2403_v0 }
 0x24c   :  { %2272 = vmatpush3.bf16.msra.mxu1 %v2590_v38 }
 0x24d   :  { %2273 = vmatprep.subr.bf16.mxu1 %v2403_v0 }
 0x24f   :  { %1972 = vmatmul.mubr.f32.vlgmr.msra.gmra.mrb[0].mxu1 %v2758_v62 }
 0x250   :  { %2275 = vmatpush3.bf16.msra.mxu1 %v2469_v12  ;;  %2006 = vmatprep.mubr.msk.f32.mxu1 %vm2404_vm0, %v2405_v1 }
 0x251   :  { %2276 = vmatprep.subr.bf16.mxu1 %v2403_v0 }
 0x254   :  { %2278 = vmatpush3.bf16.msra.mxu1 %v2472_v13 }
 0x255   :  { %2279 = vmatprep.subr.bf16.mxu1 %v2403_v0 }
 0x258   :  { %2281 = vmatpush3.bf16.msra.mxu1 %v2478_v18 }
 0x259   :  { %2282 = vmatprep.subr.bf16.mxu1 %v2403_v0 }
 0x25c   :  { %2284 = vmatpush3.bf16.msra.mxu1 %v2489_v32 }
 0x25d   :  { %2285 = vmatprep.subr.bf16.mxu1 %v2403_v0 }
 0x260   :  { %2287 = vmatpush3.bf16.msra.mxu1 %v2505_v44 }
 0x261   :  { %2288 = vmatprep.subr.bf16.mxu1 %v2403_v0 }
 0x264   :  { %2290 = vmatpush3.bf16.msra.mxu1 %v2516_v49 }
 0x265   :  { %2291 = vmatprep.subr.bf16.mxu1 %v2403_v0 }
 0x268   :  { %2293 = vmatpush3.bf16.msra.mxu1 %v2518_v50 }
 0x269   :  { %2294 = vmatprep.subr.bf16.mxu1 %v2403_v0  ;;  %v1384_v0 = vld [vmem:[%s2874_s2] ss:$0 sm:$0xff] }
 0x26c   :  { %2296 = vmatpush3.bf16.msra.mxu1 %v2520_v51 }
 0x26f   :  { %2007 = vmatmul.mubr.f32.vlgmr.msra.gmra.mrb[0].mxu1 %v2758_v62 }
 0x342   :  { %v1342_v1 = vpop.f32.mrb[0].mxu1 }
 0x343   :  { %v1346_v12 = vmul.f32 0.032258064, %v1342_v1  ;;  %v2008_v13 = vpop.f32.mrb[1].mxu1 }
 0x345   :  { %v1347_v18 = vadd.f32 1e-05, %v1346_v12 }
 0x347   :  { %2325 = vrsqrt.f32 %v1347_v18 }
 0x351   :  { %v2326_v32 = vpop.eup %2325 }
 0x352   :  { %v1357_v44 = vmul.f32 %v2326_v32, %v1356_v31 }
 0x354   :  { %v1365_v49 = vadd.f32 %v1384_v0, %v1357_v44 }
 0x356   :  { %1366 = vst [vmem:[#allocation7] sm:$0xf] %v1365_v49 }
 0x357   :  { %2382 = shalt.err (!%p2379_p6)
}
 0x358   :  { %s2383_s21 = scalar_lea.hbm %s2876_s4, 64 }
 0x359   :  { %p2384_p7 = scmp.ne.s32.totalorder %s2876_s4, %s2383_s21  ;;  %p2387_p8 = scmp.lt.u32.totalorder %s2383_s21, %s2876_s4 }
 0x35b   :  { %p2389_p9 = pnand %p2387_p8, %p2384_p7 }
 0x35d   :  { %2392 = shalt.err (!%p2389_p9)
}
 0x35e   :  { %1376 = dma.vmem_to_hbm [thread:$0]  %s1374_s18, 64, %s2876_s4, [#allocation4]  }
 0x35f   :  { %2397 = dma.done.wait [#allocation4], 64  }
 0x360   :  { %2398 = vsyncadd [#allocation4], 4294967232 }
 0x361   :  { %1380 = vsyncpa [#allocation3], 1 }
 0x362   :  { %1381 = vsyncpa [#allocation6], 1 }
 0x363   :  { %1382 = vsyncpa [#allocation4], 1 }

</bundles_post_ra>
